<compile_context>
chip_gen: v7x
topology: tpu7x:2x2x1
jax: 0.10.0
libtpu: 0.0.40
codegen_flags: <defaults>
</compile_context>

<pallas_src>
import functools

import jax
import jax.numpy as jnp
from jax import lax
from jax.experimental import pallas as pl
from jax.experimental.pallas import tpu as pltpu


def _psp_ce_kernel(main_ref, aux_ref, tgt_ref, out_ref,
                   acc_main_ref, acc_aux_ref, *, hw, tp):
    """Fused dual-head cross-entropy partial sums.

    main_ref/aux_ref : (1, C, TP) logits block  (classes on sublanes, pixels on lanes)
    tgt_ref          : (1, 1, TP) int32 targets block
    out_ref          : (1, 2, 128) per-image [main_sum, aux_sum] (broadcast over lanes)
    acc_*_ref        : (1, TP) f32 running per-lane partial sums for this image
    """
    t_idx = pl.program_id(1)
    n_tiles = pl.num_programs(1)

    @pl.when(t_idx == 0)
    def _():
        acc_main_ref[...] = jnp.zeros_like(acc_main_ref)
        acc_aux_ref[...] = jnp.zeros_like(acc_aux_ref)

    tgt = tgt_ref[0]  # (1, TP) int32

    # Mask for pixels past the true H*W extent (ragged last tile).
    pix = t_idx * tp + lax.broadcasted_iota(jnp.int32, tgt.shape, 1)  # (1, TP)
    valid = pix < hw

    def ce_tile(logits_ref):
        x = logits_ref[0].astype(jnp.float32)                 # (C, TP)
        m = jnp.max(x, axis=0, keepdims=True)                 # (1, TP)  sublane reduce
        lse = m + jnp.log(jnp.sum(jnp.exp(x - m), axis=0, keepdims=True))
        cls = lax.broadcasted_iota(jnp.int32, x.shape, 0)      # class index per sublane
        picked = jnp.sum(jnp.where(cls == tgt, x, 0.0), axis=0, keepdims=True)
        return jnp.where(valid, lse - picked, 0.0)             # (1, TP)

    acc_main_ref[...] += ce_tile(main_ref)
    acc_aux_ref[...] += ce_tile(aux_ref)

    @pl.when(t_idx == n_tiles - 1)
    def _():
        sm = jnp.broadcast_to(
            jnp.sum(acc_main_ref[...], axis=1, keepdims=True), (1, 128))
        sa = jnp.broadcast_to(
            jnp.sum(acc_aux_ref[...], axis=1, keepdims=True), (1, 128))
        out_ref[0, 0:1, :] = sm
        out_ref[0, 1:2, :] = sa


@functools.partial(jax.jit, static_argnames=("aux_weight", "tp"))
def psp_loss(main_logits, aux_logits, targets, aux_weight=0.4, tp=2048):
    """loss = CE_mean(main) + aux_weight * CE_mean(aux), both heads fused."""
    N, C, H, W = main_logits.shape
    HW = H * W

    # Free reshapes only (no transpose, no extra HBM traffic).
    x_main = main_logits.reshape(N, C, HW)
    x_aux = aux_logits.reshape(N, C, HW)
    t = targets.reshape(N, 1, HW).astype(jnp.int32)

    # Pixel tile: large for streaming efficiency, clamped to the (128-aligned) image size.
    tp_eff = min(tp, pl.cdiv(HW, 128) * 128)
    num_tp = pl.cdiv(HW, tp_eff)

    itemsize = jnp.dtype(main_logits.dtype).itemsize
    blk_in_bytes = 2 * C * tp_eff * itemsize + tp_eff * 4      # both logit blocks + targets
    vmem_need = 2 * blk_in_bytes + 2 * tp_eff * 4 + 2 * 2 * 128 * 4
    vmem_limit = int(min(32 * 2 ** 20, max(4 * 2 ** 20, 4 * vmem_need)))

    kernel = functools.partial(_psp_ce_kernel, hw=HW, tp=tp_eff)

    partials = pl.pallas_call(
        kernel,
        out_shape=jax.ShapeDtypeStruct((N, 2, 128), jnp.float32),
        grid_spec=pltpu.PrefetchScalarGridSpec(
            num_scalar_prefetch=0,
            grid=(N, num_tp),
            in_specs=[
                pl.BlockSpec((1, C, tp_eff), lambda n, t: (n, 0, t)),
                pl.BlockSpec((1, C, tp_eff), lambda n, t: (n, 0, t)),
                pl.BlockSpec((1, 1, tp_eff), lambda n, t: (n, 0, t)),
            ],
            out_specs=pl.BlockSpec((1, 2, 128), lambda n, t: (n, 0, 0)),
            scratch_shapes=[
                pltpu.VMEM((1, tp_eff), jnp.float32),
                pltpu.VMEM((1, tp_eff), jnp.float32),
            ],
        ),
        compiler_params=pltpu.CompilerParams(
            dimension_semantics=("parallel", "arbitrary"),
            vmem_limit_bytes=vmem_limit,
        ),
    )(x_main, x_aux, t)

    # partials[n, 0/1, :] holds the per-image sum broadcast across lanes.
    per_head = jnp.sum(partials[:, :, 0], axis=0)               # (2,)
    denom = jnp.float32(N * HW)
    # NOTE: no ignore_index in the reference module, so every pixel counts
    # toward both the sum and the mean denominator (matches F.cross_entropy defaults).
    return per_head[0] / denom + jnp.float32(aux_weight) * (per_head[1] / denom)


def _reference_loss(main_logits, aux_logits, targets, aux_weight=0.4):
    def ce(logits, tgt):
        x = jnp.transpose(logits, (0, 2, 3, 1)).astype(jnp.float32)  # NHWC
        logp = jax.nn.log_softmax(x, axis=-1)
        picked = jnp.take_along_axis(logp, tgt[..., None], axis=-1)[..., 0]
        return -jnp.mean(picked)
    return ce(main_logits, targets) + aux_weight * ce(aux_logits, targets)


if __name__ == "__main__":
    # PSPLoss has no learnable parameters; deterministic synthetic inputs only.
    N, C, H, W = 2, 8, 16, 16
    key = jax.random.PRNGKey(0)
    k1, k2, k3 = jax.random.split(key, 3)
    main_logits = jax.random.normal(k1, (N, C, H, W), dtype=jnp.float32)
    aux_logits = jax.random.normal(k2, (N, C, H, W), dtype=jnp.float32)
    targets = jax.random.randint(k3, (N, H, W), 0, C, dtype=jnp.int32)

    out = psp_loss(main_logits, aux_logits, targets, aux_weight=0.4)
    out = jax.block_until_ready(out)

    ref = _reference_loss(main_logits, aux_logits, targets, aux_weight=0.4)
    assert jnp.allclose(out, ref, rtol=1e-5, atol=1e-5), (out, ref)

    print("KERNEL_OK")
</pallas_src>

<mosaic_0001>
module attributes {stable_mosaic.version = 11 : i64} {
  func.func @_psp_ce_kernel(%arg0: i32, %arg1: i32, %arg2: memref<1x8x256xf32, #tpu.memory_space<vmem>>, %arg3: memref<1x8x256xf32, #tpu.memory_space<vmem>>, %arg4: memref<1x1x256xi32, #tpu.memory_space<vmem>>, %arg5: memref<1x2x128xf32, #tpu.memory_space<vmem>>, %arg6: memref<1x256xf32, #tpu.memory_space<vmem>>, %arg7: memref<1x256xf32, #tpu.memory_space<vmem>>) attributes {dimension_semantics = [#tpu.dimension_semantics<parallel>, #tpu.dimension_semantics<arbitrary>], iteration_bounds = array<i64: 2, 1>, scalar_prefetch = 0 : i64, scratch_operands = 2 : i64, tpu.core_type = #tpu.core_type<tc>, window_params = [{transform_indices = @transform_0, window_bounds = array<i64: 1, 8, 256>}, {transform_indices = @transform_1, window_bounds = array<i64: 1, 8, 256>}, {transform_indices = @transform_2, window_bounds = array<i64: 1, 1, 256>}, {transform_indices = @transform_3, window_bounds = array<i64: 1, 2, 128>}]} {
    %c0_i32 = arith.constant 0 : i32
    %0 = arith.cmpi eq, %arg1, %c0_i32 : i32
    %1 = arith.extui %0 : i1 to i32
    %c0_i32_0 = arith.constant 0 : i32
    %2 = arith.cmpi ne, %1, %c0_i32_0 : i32
    scf.if %2 {
      %cst_29 = arith.constant 0.000000e+00 : f32
      %62 = vector.broadcast %cst_29 : f32 to vector<1x256xf32>
      %c0_30 = arith.constant 0 : index
      %c0_31 = arith.constant 0 : index
      %63 = vector.load %arg6[%c0_30, %c0_31] : memref<1x256xf32, #tpu.memory_space<vmem>>, vector<1x256xf32>
      tpu.vector_store %arg6[%c0_30, %c0_31], %62 {strides = array<i32>} : memref<1x256xf32, #tpu.memory_space<vmem>>, vector<1x256xf32>,
      %cst_32 = arith.constant 0.000000e+00 : f32
      %64 = vector.broadcast %cst_32 : f32 to vector<1x256xf32>
      %c0_33 = arith.constant 0 : index
      %c0_34 = arith.constant 0 : index
      %65 = vector.load %arg7[%c0_33, %c0_34] : memref<1x256xf32, #tpu.memory_space<vmem>>, vector<1x256xf32>
      tpu.vector_store %arg7[%c0_33, %c0_34], %64 {strides = array<i32>} : memref<1x256xf32, #tpu.memory_space<vmem>>, vector<1x256xf32>,
    } else {
    }
    %c0 = arith.constant 0 : index
    %c0_1 = arith.constant 0 : index
    %c0_2 = arith.constant 0 : index
    %3 = vector.load %arg4[%c0, %c0_1, %c0_2] : memref<1x1x256xi32, #tpu.memory_space<vmem>>, vector<1x1x256xi32>
    %4 = vector.shape_cast %3 : vector<1x1x256xi32> to vector<1x256xi32>
    %c256_i32 = arith.constant 256 : i32
    %5 = arith.muli %arg1, %c256_i32 : i32
    %6 = tpu.iota {dimensions = array<i32: 1>} : vector<1x256xi32>
    %7 = vector.broadcast %5 : i32 to vector<1x256xi32>
    %8 = arith.addi %7, %6 : vector<1x256xi32>
    %c256_i32_3 = arith.constant 256 : i32
    %9 = vector.broadcast %c256_i32_3 : i32 to vector<1x256xi32>
    %10 = arith.cmpi slt, %8, %9 : vector<1x256xi32>
    %c0_4 = arith.constant 0 : index
    %c0_5 = arith.constant 0 : index
    %11 = vector.load %arg6[%c0_4, %c0_5] : memref<1x256xf32, #tpu.memory_space<vmem>>, vector<1x256xf32>
    %c0_6 = arith.constant 0 : index
    %c0_7 = arith.constant 0 : index
    %c0_8 = arith.constant 0 : index
    %12 = vector.load %arg2[%c0_6, %c0_7, %c0_8] : memref<1x8x256xf32, #tpu.memory_space<vmem>>, vector<1x8x256xf32>
    %13 = vector.shape_cast %12 : vector<1x8x256xf32> to vector<8x256xf32>
    %cst = arith.constant dense<0xFF800000> : vector<256xf32>
    %14 = vector.multi_reduction <maximumf>, %13, %cst [0] : vector<8x256xf32> to vector<256xf32>
    %15 = vector.shape_cast %14 : vector<256xf32> to vector<1x256xf32>
    %16 = vector.broadcast %15 : vector<1x256xf32> to vector<8x256xf32>
    %17 = arith.subf %13, %16 : vector<8x256xf32>
    %18 = math.exp %17 : vector<8x256xf32>
    %cst_9 = arith.constant dense<0.000000e+00> : vector<256xf32>
    %19 = vector.multi_reduction <add>, %18, %cst_9 [0] : vector<8x256xf32> to vector<256xf32>
    %20 = vector.shape_cast %19 : vector<256xf32> to vector<1x256xf32>
    %21 = math.log %20 : vector<1x256xf32>
    %22 = arith.addf %15, %21 : vector<1x256xf32>
    %23 = tpu.iota {dimensions = array<i32: 0>} : vector<8x256xi32>
    %24 = vector.broadcast %4 : vector<1x256xi32> to vector<8x256xi32>
    %25 = arith.cmpi eq, %23, %24 : vector<8x256xi32>
    %cst_10 = arith.constant 0.000000e+00 : f32
    %26 = vector.broadcast %cst_10 : f32 to vector<8x256xf32>
    %27 = arith.select %25, %13, %26 : vector<8x256xi1>, vector<8x256xf32>
    %cst_11 = arith.constant dense<0.000000e+00> : vector<256xf32>
    %28 = vector.multi_reduction <add>, %27, %cst_11 [0] : vector<8x256xf32> to vector<256xf32>
    %29 = vector.shape_cast %28 : vector<256xf32> to vector<1x256xf32>
    %30 = arith.subf %22, %29 : vector<1x256xf32>
    %cst_12 = arith.constant 0.000000e+00 : f32
    %31 = vector.broadcast %cst_12 : f32 to vector<1x256xf32>
    %32 = arith.select %10, %30, %31 : vector<1x256xi1>, vector<1x256xf32>
    %33 = arith.addf %11, %32 : vector<1x256xf32>
    %c0_13 = arith.constant 0 : index
    %c0_14 = arith.constant 0 : index
    %34 = vector.load %arg6[%c0_13, %c0_14] : memref<1x256xf32, #tpu.memory_space<vmem>>, vector<1x256xf32>
    tpu.vector_store %arg6[%c0_13, %c0_14], %33 {strides = array<i32>} : memref<1x256xf32, #tpu.memory_space<vmem>>, vector<1x256xf32>,
    %c0_15 = arith.constant 0 : index
    %c0_16 = arith.constant 0 : index
    %35 = vector.load %arg7[%c0_15, %c0_16] : memref<1x256xf32, #tpu.memory_space<vmem>>, vector<1x256xf32>
    %c0_17 = arith.constant 0 : index
    %c0_18 = arith.constant 0 : index
    %c0_19 = arith.constant 0 : index
    %36 = vector.load %arg3[%c0_17, %c0_18, %c0_19] : memref<1x8x256xf32, #tpu.memory_space<vmem>>, vector<1x8x256xf32>
    %37 = vector.shape_cast %36 : vector<1x8x256xf32> to vector<8x256xf32>
    %cst_20 = arith.constant dense<0xFF800000> : vector<256xf32>
    %38 = vector.multi_reduction <maximumf>, %37, %cst_20 [0] : vector<8x256xf32> to vector<256xf32>
    %39 = vector.shape_cast %38 : vector<256xf32> to vector<1x256xf32>
    %40 = vector.broadcast %39 : vector<1x256xf32> to vector<8x256xf32>
    %41 = arith.subf %37, %40 : vector<8x256xf32>
    %42 = math.exp %41 : vector<8x256xf32>
    %cst_21 = arith.constant dense<0.000000e+00> : vector<256xf32>
    %43 = vector.multi_reduction <add>, %42, %cst_21 [0] : vector<8x256xf32> to vector<256xf32>
    %44 = vector.shape_cast %43 : vector<256xf32> to vector<1x256xf32>
    %45 = math.log %44 : vector<1x256xf32>
    %46 = arith.addf %39, %45 : vector<1x256xf32>
    %47 = tpu.iota {dimensions = array<i32: 0>} : vector<8x256xi32>
    %48 = vector.broadcast %4 : vector<1x256xi32> to vector<8x256xi32>
    %49 = arith.cmpi eq, %47, %48 : vector<8x256xi32>
    %cst_22 = arith.constant 0.000000e+00 : f32
    %50 = vector.broadcast %cst_22 : f32 to vector<8x256xf32>
    %51 = arith.select %49, %37, %50 : vector<8x256xi1>, vector<8x256xf32>
    %cst_23 = arith.constant dense<0.000000e+00> : vector<256xf32>
    %52 = vector.multi_reduction <add>, %51, %cst_23 [0] : vector<8x256xf32> to vector<256xf32>
    %53 = vector.shape_cast %52 : vector<256xf32> to vector<1x256xf32>
    %54 = arith.subf %46, %53 : vector<1x256xf32>
    %cst_24 = arith.constant 0.000000e+00 : f32
    %55 = vector.broadcast %cst_24 : f32 to vector<1x256xf32>
    %56 = arith.select %10, %54, %55 : vector<1x256xi1>, vector<1x256xf32>
    %57 = arith.addf %35, %56 : vector<1x256xf32>
    %c0_25 = arith.constant 0 : index
    %c0_26 = arith.constant 0 : index
    %58 = vector.load %arg7[%c0_25, %c0_26] : memref<1x256xf32, #tpu.memory_space<vmem>>, vector<1x256xf32>
    tpu.vector_store %arg7[%c0_25, %c0_26], %57 {strides = array<i32>} : memref<1x256xf32, #tpu.memory_space<vmem>>, vector<1x256xf32>,
    %c0_i32_27 = arith.constant 0 : i32
    %59 = arith.cmpi eq, %arg1, %c0_i32_27 : i32
    %60 = arith.extui %59 : i1 to i32
    %c0_i32_28 = arith.constant 0 : i32
    %61 = arith.cmpi ne, %60, %c0_i32_28 : i32
    scf.if %61 {
      %c0_29 = arith.constant 0 : index
      %c0_30 = arith.constant 0 : index
      %62 = vector.load %arg6[%c0_29, %c0_30] : memref<1x256xf32, #tpu.memory_space<vmem>>, vector<1x256xf32>
      %cst_31 = arith.constant dense<0.000000e+00> : vector<1xf32>
      %63 = vector.multi_reduction <add>, %62, %cst_31 [1] : vector<1x256xf32> to vector<1xf32>
      %64 = vector.shape_cast %63 : vector<1xf32> to vector<1x1xf32>
      %65 = vector.shape_cast %64 : vector<1x1xf32> to vector<1x1xf32>
      %66 = vector.broadcast %65 : vector<1x1xf32> to vector<1x128xf32>
      %c0_32 = arith.constant 0 : index
      %c0_33 = arith.constant 0 : index
      %67 = vector.load %arg7[%c0_32, %c0_33] : memref<1x256xf32, #tpu.memory_space<vmem>>, vector<1x256xf32>
      %cst_34 = arith.constant dense<0.000000e+00> : vector<1xf32>
      %68 = vector.multi_reduction <add>, %67, %cst_34 [1] : vector<1x256xf32> to vector<1xf32>
      %69 = vector.shape_cast %68 : vector<1xf32> to vector<1x1xf32>
      %70 = vector.shape_cast %69 : vector<1x1xf32> to vector<1x1xf32>
      %71 = vector.broadcast %70 : vector<1x1xf32> to vector<1x128xf32>
      %c0_35 = arith.constant 0 : index
      %c0_36 = arith.constant 0 : index
      %c0_37 = arith.constant 0 : index
      %72 = vector.load %arg5[%c0_35, %c0_36, %c0_37] : memref<1x2x128xf32, #tpu.memory_space<vmem>>, vector<1x1x128xf32>
      %73 = vector.shape_cast %72 : vector<1x1x128xf32> to vector<1x128xf32>
      %74 = vector.shape_cast %66 : vector<1x128xf32> to vector<1x1x128xf32>
      tpu.vector_store %arg5[%c0_35, %c0_36, %c0_37], %74 {strides = array<i32>} : memref<1x2x128xf32, #tpu.memory_space<vmem>>, vector<1x1x128xf32>,
      %c0_38 = arith.constant 0 : index
      %c1 = arith.constant 1 : index
      %c0_39 = arith.constant 0 : index
      %75 = vector.load %arg5[%c0_38, %c1, %c0_39] : memref<1x2x128xf32, #tpu.memory_space<vmem>>, vector<1x1x128xf32>
      %76 = vector.shape_cast %75 : vector<1x1x128xf32> to vector<1x128xf32>
      %77 = vector.shape_cast %71 : vector<1x128xf32> to vector<1x1x128xf32>
      tpu.vector_store %arg5[%c0_38, %c1, %c0_39], %77 {strides = array<i32>} : memref<1x2x128xf32, #tpu.memory_space<vmem>>, vector<1x1x128xf32>,
    } else {
    }
    return
  }
  func.func @transform_0(%arg0: i32, %arg1: i32) -> (i32, i32, i32) {
    %c0_i32 = arith.constant 0 : i32
    %c0_i32_0 = arith.constant 0 : i32
    return %arg0, %c0_i32, %arg1 : i32, i32, i32
  }
  func.func @transform_1(%arg0: i32, %arg1: i32) -> (i32, i32, i32) {
    %c0_i32 = arith.constant 0 : i32
    %c0_i32_0 = arith.constant 0 : i32
    return %arg0, %c0_i32, %arg1 : i32, i32, i32
  }
  func.func @transform_2(%arg0: i32, %arg1: i32) -> (i32, i32, i32) {
    %c0_i32 = arith.constant 0 : i32
    %c0_i32_0 = arith.constant 0 : i32
    return %arg0, %c0_i32, %arg1 : i32, i32, i32
  }
  func.func @transform_3(%arg0: i32, %arg1: i32) -> (i32, i32, i32) {
    %c0_i32 = arith.constant 0 : i32
    %c0_i32_0 = arith.constant 0 : i32
    %c0_i32_1 = arith.constant 0 : i32
    return %arg0, %c0_i32, %c0_i32_0 : i32, i32, i32
  }
}

</mosaic_0001>

<bundles_post_ra>
// kernel: psp_loss.1
= control target key start
LH: loop header
LB: loop body
LE: loop exit
PB: predicated region body
PF: predicated region fallthrough
CT: control target
= control target key end

     0   :  { %s699_s12 = smov 0   ;;  %s701_s13 = smov 0   ;;  %s791_s0 = inlined_call_operand.vmem [shape: f32[2,8,256], index: 0, kind: input, shape index: {}]   ;;  %s792_s1 = inlined_call_operand.vmem [shape: f32[2,8,256], index: 1, kind: input, shape index: {}]   ;;  %s793_s2 = inlined_call_operand.vmem [shape: s32[2,1,256], index: 2, kind: input, shape index: {}]   ;;  %s794_s3 = inlined_call_operand.vmem [shape: f32[2,2,128], index: 3, kind: output, shape index: {}]  }
   0x1   :  { %s703_s14 = smov 0  }
   0x2 LB: > { %s25_s15 = sadd.s32 1, %s671_s13  ;;  %p600_p0 = scmp.ge.s32.totalorder %s675_s14, 1  ;;  %s675_s14 = sphi %s703_s14, %s13_s14   ;;  %s671_s13 = sphi %s701_s13, %s798_s13   ;;  %s667_s12 = sphi %s699_s12, %s797_s12  }
   0x3   : > { %p27_p1 = scmp.ge.s32.totalorder %s25_s15, 2  ;;  %p189_p2 = scmp.lt.s32.totalorder %s675_s14, 3 }
   0x5   : > { %s800_s15 = smov (%p27_p1, %s25_s15), 0  ;;  %p190_p3 = pnand %p600_p0, %p189_p2 }
   0x6   : > { %p234_p4 = scmp.lt.s32.totalorder (!%p190_p3), %s667_s12, 1  ;;  %v270_v0 = vlaneseq (!%p190_p3)  ;;  %v677_v2 = vmov (!%p190_p3), 0.0   ;;  %vm471_vm3 = vcmask (!%p190_p3), 1040384  }
   0x7   : > { %193 = sbr.rel (%p190_p3) target bundleno = 243 (0xf3), region = 32 }
   0x8   : > { %vm719_vm0 = vcmp.lt.s32.totalorder (!%p190_p3), %v270_v0, 256  ;;  %v745_v33 = vshrl.u32 (!%p190_p3), %v270_v0, 7 }
   0x9   : > { %274 = vst.msk [vmem:[#allocation2] sm:$0x3] (!%p190_p3), %vm719_vm0, %v677_v2  ;;  %275 = vst.msk [vmem:[#allocation3] sm:$0x3] (!%p190_p3), %vm719_vm0, %v677_v2 }
   0xa   : > { %v755_v40 = vsub.s32 (!%p190_p3), 0, %v745_v33  ;;  %v758_v42 = vsub.s32 (!%p190_p3), 1, %v745_v33 }
   0xe   : > { %s802_s12 = smov (!%p234_p4, %s667_s12), 1 }
   0xf   : > { %s609_s16 = sshll.u32 %s802_s12, 4  ;;  %s605_s23 = sshll.u32 %s802_s12, 1 }
  0x10   : > { %s241_s19 = scalar_lea.vmem %s791_s0, %s609_s16  ;;  %s251_s22 = scalar_lea.vmem %s792_s1, %s609_s16 }
  0x11   : > { %v287_v3 = vld [vmem:[%s241_s19] sm:$0xff]  ;;  %v288_v4 = vld [vmem:[%s241_s19 + $0x8] sm:$0xff]  ;;  %s260_s26 = scalar_lea.vmem %s793_s2, %s605_s23  ;;  %s265_s29 = scalar_lea.vmem %s794_s3, %s605_s23 }
  0x12   : > { %v380_v5 = vld [vmem:[%s251_s22] sm:$0xff]  ;;  %v289_v6 = vrot.slane %v287_v3, 4  ;;  %v295_v7 = vrot.slane %v288_v4, 4  ;;  %v381_v8 = vld [vmem:[%s251_s22 + $0x8] sm:$0xff] }
  0x13   : > { %v382_v9 = vrot.slane %v380_v5, 4  ;;  %v388_v10 = vrot.slane %v381_v8, 4  ;;  %v276_v41 = vld [vmem:[%s260_s26] sm:$0x3] }
  0x14   : > { %v290_v11 = vmax.f32 %v287_v3, %v289_v6  ;;  %v296_v12 = vmax.f32 %v288_v4, %v295_v7  ;;  %v330_v43 = vrot.slane %v276_v41, %v755_v40  ;;  %v334_v44 = vrot.slane %v276_v41, %v758_v42 }
  0x15   : > { %v383_v13 = vmax.f32 %v380_v5, %v382_v9  ;;  %v389_v14 = vmax.f32 %v381_v8, %v388_v10 }
  0x16   : > { %v291_v15 = vrot.slane %v290_v11, 2  ;;  %v297_v16 = vrot.slane %v296_v12, 2  ;;  %vm335_vm1 = vcmp.eq.s32.totalorder %v745_v33, %v330_v43  ;;  %vm336_vm2 = vcmp.eq.s32.totalorder %v745_v33, %v334_v44 }
  0x17   : > { %v384_v17 = vrot.slane %v383_v13, 2  ;;  %v390_v18 = vrot.slane %v389_v14, 2  ;;  %v337_v48 = vsel %vm335_vm1, %v287_v3, 0.0  ;;  %v338_v51 = vsel %vm336_vm2, %v288_v4, 0.0 }
  0x18   : > { %v292_v19 = vmax.f32 %v290_v11, %v291_v15  ;;  %v298_v20 = vmax.f32 %v296_v12, %v297_v16  ;;  %v418_v55 = vsel %vm335_vm1, %v380_v5, 0.0  ;;  %v339_v57 = vrot.slane %v337_v48, 4 }
  0x19   : > { %v385_v21 = vmax.f32 %v383_v13, %v384_v17  ;;  %v391_v22 = vmax.f32 %v389_v14, %v390_v18  ;;  %v419_v59 = vsel %vm336_vm2, %v381_v8, 0.0  ;;  %v345_v61 = vrot.slane %v338_v51, 4 }
  0x1a   : > { %v293_v23 = vrot.slane %v292_v19, 1  ;;  %v299_v24 = vrot.slane %v298_v20, 1  ;;  %v420_v2 = vrot.slane %v418_v55, 4  ;;  %v340_v10 = vadd.f32 %v339_v57, %v337_v48 }
  0x1b   : > { %v386_v25 = vrot.slane %v385_v21, 1  ;;  %v392_v26 = vrot.slane %v391_v22, 1  ;;  %v346_v12 = vadd.f32 %v345_v61, %v338_v51 }
  0x1c   : > { %v734_v27 = vmax.f32 %v292_v19, %v293_v23  ;;  %v736_v28 = vmax.f32 %v298_v20, %v299_v24  ;;  %v421_v15 = vadd.f32 %v420_v2, %v418_v55  ;;  %v341_v19 = vrot.slane %v340_v10, 2 }
  0x1d   : > { %v739_v29 = vmax.f32 %v385_v21, %v386_v25  ;;  %v741_v30 = vmax.f32 %v391_v22, %v392_v26  ;;  %v347_v21 = vrot.slane %v346_v12, 2 }
  0x1e   : > { %v301_v31 = vsub.f32 %v287_v3, %v734_v27  ;;  %v302_v32 = vsub.f32 %v288_v4, %v736_v28  ;;  %v426_v3 = vrot.slane %v419_v59, 4  ;;  %v422_v24 = vrot.slane %v421_v15, 2 }
  0x1f   : > { %v394_v34 = vsub.f32 %v380_v5, %v739_v29  ;;  %v395_v35 = vsub.f32 %v381_v8, %v741_v30  ;;  %v342_v26 = vadd.f32 %v341_v19, %v340_v10  ;;  %v379_v10 = vld [vmem:[#allocation3] sm:$0x3] }
  0x20   : > { %v303_v36 = vmul.f32 1.442695, %v301_v31  ;;  %v305_v37 = vmul.f32 1.442695, %v302_v32  ;;  %v427_v17 = vadd.f32 %v426_v3, %v419_v59  ;;  %v348_v31 = vadd.f32 %v347_v21, %v346_v12 }
  0x21   : > { %v396_v38 = vmul.f32 1.442695, %v394_v34  ;;  %v398_v39 = vmul.f32 1.442695, %v395_v35  ;;  %v423_v32 = vadd.f32 %v422_v24, %v421_v15  ;;  %v343_v35 = vrot.slane %v342_v26, 1 }
  0x22   : > { %637 = vpow2.f32 %v303_v36  ;;  %v428_v25 = vrot.slane %v427_v17, 2  ;;  %v349_v36 = vrot.slane %v348_v31, 1 }
  0x23   : > { %639 = vpow2.f32 %v305_v37  ;;  %v678_v37 = vmov 1966171168  }
  0x24   : > { %641 = vpow2.f32 %v396_v38  ;;  %v429_v34 = vadd.f32 %v428_v25, %v427_v17  ;;  %v359_v38 = vunpack.c.l.s4 %v678_v37 }
  0x25   : > { %643 = vpow2.f32 %v398_v39  ;;  %v424_v39 = vrot.slane %v423_v32, 1 }
  0x26   : > { %v430_v43 = vrot.slane %v429_v34, 1 }
  0x28   : > { %v431_v57 = vadd.f32 %v430_v43, %v429_v34 }
  0x2c   : > { %v638_v45 = vpop.eup %637 }
  0x2d   : > { %v640_v46 = vpop.eup %639  ;;  %v307_v47 = vrot.slane %v638_v45, 4 }
  0x2e   : > { %v642_v49 = vpop.eup %641  ;;  %v313_v50 = vrot.slane %v640_v46, 4 }
  0x2f   : > { %v644_v52 = vpop.eup %643  ;;  %v308_v53 = vadd.f32 %v638_v45, %v307_v47  ;;  %v400_v54 = vrot.slane %v642_v49, 4 }
  0x30   : > { %v314_v56 = vadd.f32 %v640_v46, %v313_v50  ;;  %v406_v58 = vrot.slane %v644_v52, 4  ;;  %v344_v46 = vadd.f32 %v343_v35, %v342_v26  ;;  %v360_v50 = vunpack.c.0.s8 %v359_v38 }
  0x31   : > { %v309_v60 = vrot.slane %v308_v53, 2  ;;  %v401_v62 = vadd.f32 %v642_v49, %v400_v54  ;;  %v350_v49 = vadd.f32 %v349_v36, %v348_v31  ;;  %v425_v54 = vadd.f32 %v424_v39, %v423_v32 }
  0x32   : > { %v315_v63 = vrot.slane %v314_v56, 2  ;;  %v407_v0 = vadd.f32 %v644_v52, %v406_v58  ;;  %v363_v61 = vsub.s32 %v360_v50, %v745_v33 }
  0x33   : > { %v310_v6 = vadd.f32 %v309_v60, %v308_v53  ;;  %v402_v7 = vrot.slane %v401_v62, 2 }
  0x34   : > { %v316_v9 = vadd.f32 %v315_v63, %v314_v56  ;;  %v408_v4 = vrot.slane %v407_v0, 2 }
  0x35   : > { %v311_v11 = vrot.slane %v310_v6, 1  ;;  %v403_v13 = vadd.f32 %v402_v7, %v401_v62 }
  0x36   : > { %v317_v5 = vrot.slane %v316_v9, 1  ;;  %v409_v14 = vadd.f32 %v408_v4, %v407_v0 }
  0x37   : > { %v312_v16 = vadd.f32 %v311_v11, %v310_v6  ;;  %v404_v8 = vrot.slane %v403_v13, 1 }
  0x38   : > { %v318_v18 = vadd.f32 %v317_v5, %v316_v9  ;;  %v410_v20 = vrot.slane %v409_v14, 1 }
  0x39   : > { %645 = vlog2.f32 %v312_v16  ;;  %v405_v22 = vadd.f32 %v404_v8, %v403_v13 }
  0x3a   : > { %647 = vlog2.f32 %v318_v18  ;;  %v411_v23 = vadd.f32 %v410_v20, %v409_v14 }
  0x3b   : > { %649 = vlog2.f32 %v405_v22 }
  0x3c   : > { %651 = vlog2.f32 %v411_v23 }
  0x43   : > { %v646_v41 = vpop.eup %645 }
  0x44   : > { %v648_v44 = vpop.eup %647  ;;  %v320_v45 = vmul.f32 0.6931472, %v646_v41 }
  0x45   : > { %v650_v47 = vpop.eup %649  ;;  %v322_v48 = vmul.f32 0.6931472, %v648_v44 }
  0x46   : > { %v652_v51 = vpop.eup %651  ;;  %v323_v52 = vadd.f32 %v320_v45, %v734_v27  ;;  %v413_v53 = vmul.f32 0.6931472, %v650_v47  ;;  %v286_v27 = vld [vmem:[#allocation2] sm:$0x3] }
  0x47   : > { %v324_v55 = vadd.f32 %v322_v48, %v736_v28  ;;  %v415_v56 = vmul.f32 0.6931472, %v652_v51 }
  0x48   : > { %v351_v58 = vsub.f32 %v323_v52, %v344_v46  ;;  %v416_v59 = vadd.f32 %v413_v53, %v739_v29 }
  0x49   : > { %v352_v60 = vsub.f32 %v324_v55, %v350_v49  ;;  %v417_v62 = vadd.f32 %v415_v56, %v741_v30 }
  0x4a   : > { %v432_v63 = vsub.f32 %v416_v59, %v425_v54 }
  0x4b   : > { %v357_v0 = vcombine.low %v351_v58, %v352_v60  ;;  %v433_v2 = vsub.f32 %v417_v62, %v431_v57 }
  0x4d   : > { %v364_v6 = vrot.slane %v357_v0, %v363_v61  ;;  %v438_v7 = vcombine.low %v432_v63, %v433_v2 }
  0x4f   : > { %v371_v3 = vrot.slane %v364_v6, %v363_v61  ;;  %v445_v9 = vrot.slane %v438_v7, %v363_v61 }
  0x51   : > { %v373_v28 = vadd.f32 %v371_v3, %v286_v27  ;;  %v452_v4 = vrot.slane %v445_v9, %v363_v61 }
  0x53   : > { %378 = vst.msk [vmem:[#allocation2] sm:$0x3] %vm719_vm0, %v373_v28  ;;  %v454_v29 = vadd.f32 %v452_v4, %v379_v10 }
  0x55   : > { %455 = vst.msk [vmem:[#allocation3] sm:$0x3] %vm719_vm0, %v454_v29 }
  0x5a   : > { %v459_v30 = vld [vmem:[#allocation2] sm:$0x3] }
  0x5b   : > { %v464_v33 = vrot.slane %v459_v30, %v755_v40  ;;  %v468_v11 = vrot.slane %v459_v30, %v758_v42 }
  0x5c   : > { %v477_v12 = vld [vmem:[#allocation3] sm:$0x3] }
  0x5d   : > { %v472_v13 = vsel %vm471_vm3, %v464_v33, 0.0  ;;  %v473_v5 = vsel %vm471_vm3, %v468_v11, 0.0  ;;  %v482_v14 = vrot.slane %v477_v12, %v755_v40  ;;  %v486_v15 = vrot.slane %v477_v12, %v758_v42 }
  0x5e   : > { %v474_v16 = vadd.f32 %v473_v5, %v472_v13 }
  0x5f   : > { %v489_v8 = vsel %vm471_vm3, %v482_v14, 0.0  ;;  %v490_v17 = vsel %vm471_vm3, %v486_v15, 0.0 }
  0x60   : > { %475 = vadd.xlane.f32.xlu0 %v474_v16  ;;  %v491_v1 = vadd.f32 %v490_v17, %v489_v8 }
  0x64   : > { %492 = vadd.xlane.f32.xlu0 %v491_v1 }
  0xed   : > { %v476_v18 = vpop.xlane.xlu0 %475 }
  0xee   : > { %494 = vst [vmem:[%s265_s29] sm:$0x1] %v476_v18 }
  0xf1   : > { %v493_v19 = vpop.xlane.xlu0 %492 }
  0xf2   : > { %495 = vst [vmem:[%s265_s29 + $0x1] sm:$0x1] %v493_v19 }
  0xf3 PF: > { %s13_s14 = sadd.s32 1, %s675_s14   ;;  %s797_s12 = smov %s671_s13 }
  0xf4   : > { %p10_p5 = scmp.ge.s32.totalorder %s13_s14, 4   ;;  %s798_s13 = smov %s800_s15 }
  0xf6   :  { %12 = sbr.rel (!%p10_p5) target bundleno = 2 (0x2), region = 76 }

</bundles_post_ra>
